<compile_context>
chip_gen: v6e
topology: v6e:2x2x1
jax: 0.10.0
libtpu: 0.0.40
codegen_flags: <defaults>
</compile_context>

<pallas_src>
import functools

import jax
import jax.numpy as jnp
from jax.experimental import pallas as pl
from jax.experimental.pallas import tpu as pltpu


def _round_up(x, m):
    return ((x + m - 1) // m) * m


def _loss_kernel(label_ref, cls_ref, pse_ref, ste_ref, tmap_ref, out_ref,
                 acc_cls_ref, acc_sem_ref, acc_trans_ref,
                 *, batch, block_b, tiles_per_chunk):
    p = pl.program_id(0)
    t = pl.program_id(1)

    # Per-chunk scalar accumulators live in VMEM scratch (persist across t);
    # re-initialize at the first batch tile of each chunk.
    @pl.when(t == 0)
    def _():
        acc_cls_ref[...] = jnp.zeros_like(acc_cls_ref)
        acc_sem_ref[...] = jnp.zeros_like(acc_sem_ref)
        acc_trans_ref[...] = jnp.zeros_like(acc_trans_ref)

    label = label_ref[...]                      # (bb, 1) int32
    cls_nat = cls_ref[...]                      # (bb, C)  native dtype
    pse_nat = pse_ref[...]                      # (bb, C)  native dtype
    ste_nat = ste_ref[...]                      # (bb, C2) native dtype

    bb, C = cls_nat.shape
    C2 = ste_nat.shape[1]

    # Rows beyond the real batch (ragged last tile) hold unspecified data;
    # gate every per-row term with a select so NaN/Inf garbage never reaches
    # the partial sums (no host-side padding anywhere).
    tile_idx = p * tiles_per_chunk + t
    row = jax.lax.broadcasted_iota(jnp.int32, (bb, 1), 0) + tile_idx * block_b
    valid = row < batch                         # (bb, 1) bool

    iota_c = jax.lax.broadcasted_iota(jnp.int32, (bb, C), 1)
    onehot = iota_c == label                    # (bb, C) bool

    # ---- L_cls partial sum: softmax cross entropy (f32 only where needed) ----
    cls_f32 = cls_nat.astype(jnp.float32)
    m = jnp.max(cls_f32, axis=1, keepdims=True)
    lse = m + jnp.log(jnp.sum(jnp.exp(cls_f32 - m), axis=1, keepdims=True))
    picked_cls = jnp.sum(jnp.where(onehot, cls_f32, 0.0), axis=1, keepdims=True)
    s_cls = jnp.sum(jnp.where(valid, lse - picked_cls, 0.0),
                    axis=0, keepdims=True)      # (1, 1)

    # ---- L_sem partial sum: 1 - logit_pse[i, label[i]] ----
    # Native dtype throughout; single nonzero per row so the sum is exact,
    # then cast only the picked column to f32.
    picked_pse = jnp.sum(jnp.where(onehot, pse_nat, 0),
                         axis=1, keepdims=True).astype(jnp.float32)
    s_sem = jnp.sum(jnp.where(valid, 1.0 - picked_pse, 0.0),
                    axis=0, keepdims=True)      # (1, 1)

    # ---- L_trans partial sum ----
    # Row gather mask[i,:] = trans_map[label[i],:] via a bf16 one-hot matmul
    # on the MXU (exact for 0/1 transition maps; MXU is not the binding slot).
    onehot_bf = onehot.astype(jnp.bfloat16)
    mask = jnp.dot(onehot_bf, tmap_ref[...],
                   preferred_element_type=jnp.float32)         # (bb, C2) 0/1
    masked = ste_nat * mask.astype(ste_nat.dtype)              # native dtype
    iota_c2 = jax.lax.broadcasted_iota(jnp.int32, (bb, C2), 1)
    maxv = jnp.max(masked, axis=1, keepdims=True)
    # first index achieving the max (matches torch.argmax tie-breaking)
    jstar = jnp.min(jnp.where(masked == maxv, iota_c2, C2),
                    axis=1, keepdims=True)
    picked_ste = jnp.sum(jnp.where(iota_c2 == jstar, ste_nat, 0),
                         axis=1, keepdims=True).astype(jnp.float32)
    s_trans = jnp.sum(jnp.where(valid, 1.0 - picked_ste, 0.0),
                      axis=0, keepdims=True)    # (1, 1)

    acc_cls_ref[...] += s_cls
    acc_sem_ref[...] += s_sem
    acc_trans_ref[...] += s_trans

    # Pack the three per-chunk sums into lanes 0..2 of the lane-dense output
    # only once, on the last batch tile of this chunk (single dense store).
    @pl.when(t == pl.num_programs(1) - 1)
    def _():
        lane = jax.lax.broadcasted_iota(jnp.int32, out_ref.shape, 2)  # (1,1,128)
        out_ref[...] = (jnp.where(lane == 0, acc_cls_ref[...], 0.0)
                        + jnp.where(lane == 1, acc_sem_ref[...], 0.0)
                        + jnp.where(lane == 2, acc_trans_ref[...], 0.0))


def _device_kind():
    try:
        return jax.devices()[0].device_kind.lower()
    except Exception:
        return ""


def loss_pallas(label, logit_cls, logit_pse, logit_ste, trans_map,
                *, block_b=None):
    B, C = logit_cls.shape
    C2 = logit_ste.shape[1]

    kind = _device_kind()
    is_v7x = ("v7" in kind) or ("7x" in kind)
    # 2 TensorCores per chip: v7x (2 TCs) and v3/v4 (megacore); v5e/v6e: 1 TC.
    multi_tc = is_v7x or ("v3" in kind) or ("v4" in kind)

    in_bytes = max(logit_cls.dtype.itemsize, logit_pse.dtype.itemsize,
                   logit_ste.dtype.itemsize)

    # --- VMEM-aware batch tile --------------------------------------------
    # A (bb, C) tile really occupies ceil(C/128)*128 lanes; count x2 for the
    # double-buffered input tiles (+label) plus the in-kernel f32/i32 temps.
    Cp, C2p = _round_up(C, 128), _round_up(C2, 128)
    per_row = (2 * ((2 * Cp + C2p) * in_bytes + 128 * 4)   # inputs+label, 2 bufs
               + (3 * Cp + 4 * C2p) * 4)                   # f32/i32 temporaries
    budget = (16 if is_v7x else 32) * 1024 * 1024          # v7x: 64 MiB physical
    vmem_limit = (44 if is_v7x else 80) * 1024 * 1024      # v5e/v6e: 128 MiB

    if block_b is None:
        block_b = max(8, budget // per_row)
    if B <= block_b:
        bb = B                 # single tile; "full dim" exemption from (8, .)
    else:
        bb = max(8, (block_b // 8) * 8)

    total_tiles = -(-B // bb)  # ceil; last tile may be ragged (masked in-kernel)
    P = 2 if (multi_tc and total_tiles >= 2 and total_tiles % 2 == 0) else 1
    T = total_tiles // P

    # Tiny, copy-cheap host-side prep (no full-array padding anywhere).
    label2d = label.reshape(B, 1).astype(jnp.int32)
    # Cast trans_map to bf16 once (exact for 0/1 transition maps).
    tmap_bf = trans_map.astype(jnp.bfloat16)

    kernel = functools.partial(_loss_kernel, batch=B, block_b=bb,
                               tiles_per_chunk=T)

    cost = pl.CostEstimate(
        flops=int(2 * B * C * C2 + 10 * B * C + 12 * B * C2),
        transcendentals=int(B * C + B),
        bytes_accessed=int(B * (2 * C + C2) * in_bytes + B * 4
                           + C * C2 * 2 + P * 128 * 4),
    )

    out = pl.pallas_call(
        kernel,
        out_shape=jax.ShapeDtypeStruct((P, 1, 128), jnp.float32),
        grid_spec=pltpu.PrefetchScalarGridSpec(
            num_scalar_prefetch=0,
            grid=(P, T),
            in_specs=[
                pl.BlockSpec((bb, 1), lambda p, t: (p * T + t, 0)),
                pl.BlockSpec((bb, C), lambda p, t: (p * T + t, 0)),
                pl.BlockSpec((bb, C), lambda p, t: (p * T + t, 0)),
                pl.BlockSpec((bb, C2), lambda p, t: (p * T + t, 0)),
                pl.BlockSpec((C, C2), lambda p, t: (0, 0)),
            ],
            out_specs=pl.BlockSpec((1, 1, 128), lambda p, t: (p, 0, 0)),
            scratch_shapes=[pltpu.VMEM((1, 1), jnp.float32)] * 3,
        ),
        compiler_params=pltpu.CompilerParams(
            # Axis 0 is independent work ("parallel"; shards across TCs on
            # multi-core parts); the batch/reduction axis must be "arbitrary"
            # because the output block + scratch are resident across it.
            dimension_semantics=("parallel", "arbitrary"),
            vmem_limit_bytes=vmem_limit,
        ),
        cost_estimate=cost,
    )(label2d, logit_cls, logit_pse, logit_ste, tmap_bf)

    sums = jnp.sum(out[:, 0, :3], axis=0)       # combine per-chunk partials
    l = sums / B
    return l[0], l[1], l[2]


def loss_ref(label, logit_cls, logit_pse, logit_ste, trans_map):
    """Pure-JAX reference mirroring the PyTorch module."""
    B = label.shape[0]
    idx = jnp.arange(B)
    logp = jax.nn.log_softmax(logit_cls, axis=1)
    L_cls = -jnp.mean(logp[idx, label])
    L_sem = jnp.mean(1.0 - logit_pse[idx, label])
    mask = trans_map[label, :].astype(jnp.float32)
    label_ = jnp.argmax(logit_ste * mask, axis=1)
    L_trans = jnp.mean(1.0 - logit_ste[idx, label_])
    return L_cls, L_sem, L_trans


if __name__ == "__main__":
    key = jax.random.PRNGKey(0)
    B, C_CLS, C_STE = 8, 10, 12

    k1, k2, k3, k4 = jax.random.split(key, 4)
    label = jax.random.randint(k1, (B,), 0, C_CLS, dtype=jnp.int32)
    logit_cls = jax.random.normal(k2, (B, C_CLS), dtype=jnp.float32)
    logit_pse = jax.random.normal(k3, (B, C_CLS), dtype=jnp.float32)
    logit_ste = jax.random.normal(k4, (B, C_STE), dtype=jnp.float32)

    # Deterministic synthetic trans_map (args.trans_map): binary (C_CLS, C_STE).
    trans_map = (
        (jnp.arange(C_CLS)[:, None] % 3) == (jnp.arange(C_STE)[None, :] % 3)
    ).astype(jnp.float32)

    l_cls, l_sem, l_trans = loss_pallas(label, logit_cls, logit_pse, logit_ste,
                                        trans_map)
    jax.block_until_ready((l_cls, l_sem, l_trans))

    r_cls, r_sem, r_trans = loss_ref(label, logit_cls, logit_pse, logit_ste,
                                     trans_map)
    assert jnp.allclose(l_cls, r_cls, atol=1e-5), (l_cls, r_cls)
    assert jnp.allclose(l_sem, r_sem, atol=1e-5), (l_sem, r_sem)
    assert jnp.allclose(l_trans, r_trans, atol=1e-5), (l_trans, r_trans)

    print("KERNEL_OK")
</pallas_src>

<mosaic_0001>
module attributes {stable_mosaic.version = 11 : i64} {
  func.func @_loss_kernel(%arg0: i32, %arg1: i32, %arg2: memref<8x1xi32, #tpu.memory_space<vmem>>, %arg3: memref<8x10xf32, #tpu.memory_space<vmem>>, %arg4: memref<8x10xf32, #tpu.memory_space<vmem>>, %arg5: memref<8x12xf32, #tpu.memory_space<vmem>>, %arg6: memref<10x12xbf16, #tpu.memory_space<vmem>>, %arg7: memref<1x1x128xf32, #tpu.memory_space<vmem>>, %arg8: memref<1x1xf32, #tpu.memory_space<vmem>>, %arg9: memref<1x1xf32, #tpu.memory_space<vmem>>, %arg10: memref<1x1xf32, #tpu.memory_space<vmem>>) attributes {dimension_semantics = [#tpu.dimension_semantics<parallel>, #tpu.dimension_semantics<arbitrary>], iteration_bounds = array<i64: 1, 1>, scalar_prefetch = 0 : i64, scratch_operands = 3 : i64, tpu.core_type = #tpu.core_type<tc>, window_params = [{transform_indices = @transform_0, window_bounds = array<i64: 8, 1>}, {transform_indices = @transform_1, window_bounds = array<i64: 8, 10>}, {transform_indices = @transform_2, window_bounds = array<i64: 8, 10>}, {transform_indices = @transform_3, window_bounds = array<i64: 8, 12>}, {pipeline_mode = #tpu.pipeline_mode<synchronous>, transform_indices = @transform_4, window_bounds = array<i64: 10, 12>}, {transform_indices = @transform_5, window_bounds = array<i64: 1, 1, 128>}]} {
    %c0_i32 = arith.constant 0 : i32
    %0 = arith.cmpi eq, %arg1, %c0_i32 : i32
    %1 = arith.extui %0 : i1 to i32
    %c0_i32_0 = arith.constant 0 : i32
    %2 = arith.cmpi ne, %1, %c0_i32_0 : i32
    scf.if %2 {
      %cst_43 = arith.constant 0.000000e+00 : f32
      %87 = vector.broadcast %cst_43 : f32 to vector<1x1xf32>
      %c0_44 = arith.constant 0 : index
      %c0_45 = arith.constant 0 : index
      %88 = vector.load %arg8[%c0_44, %c0_45] : memref<1x1xf32, #tpu.memory_space<vmem>>, vector<1x1xf32>
      tpu.vector_store %arg8[%c0_44, %c0_45], %87 {strides = array<i32>} : memref<1x1xf32, #tpu.memory_space<vmem>>, vector<1x1xf32>,
      %cst_46 = arith.constant 0.000000e+00 : f32
      %89 = vector.broadcast %cst_46 : f32 to vector<1x1xf32>
      %c0_47 = arith.constant 0 : index
      %c0_48 = arith.constant 0 : index
      %90 = vector.load %arg9[%c0_47, %c0_48] : memref<1x1xf32, #tpu.memory_space<vmem>>, vector<1x1xf32>
      tpu.vector_store %arg9[%c0_47, %c0_48], %89 {strides = array<i32>} : memref<1x1xf32, #tpu.memory_space<vmem>>, vector<1x1xf32>,
      %cst_49 = arith.constant 0.000000e+00 : f32
      %91 = vector.broadcast %cst_49 : f32 to vector<1x1xf32>
      %c0_50 = arith.constant 0 : index
      %c0_51 = arith.constant 0 : index
      %92 = vector.load %arg10[%c0_50, %c0_51] : memref<1x1xf32, #tpu.memory_space<vmem>>, vector<1x1xf32>
      tpu.vector_store %arg10[%c0_50, %c0_51], %91 {strides = array<i32>} : memref<1x1xf32, #tpu.memory_space<vmem>>, vector<1x1xf32>,
    } else {
    }
    %c0 = arith.constant 0 : index
    %c0_1 = arith.constant 0 : index
    %3 = vector.load %arg2[%c0, %c0_1] : memref<8x1xi32, #tpu.memory_space<vmem>>, vector<8x1xi32>
    %c0_2 = arith.constant 0 : index
    %c0_3 = arith.constant 0 : index
    %4 = vector.load %arg3[%c0_2, %c0_3] : memref<8x10xf32, #tpu.memory_space<vmem>>, vector<8x10xf32>
    %c0_4 = arith.constant 0 : index
    %c0_5 = arith.constant 0 : index
    %5 = vector.load %arg4[%c0_4, %c0_5] : memref<8x10xf32, #tpu.memory_space<vmem>>, vector<8x10xf32>
    %c0_6 = arith.constant 0 : index
    %c0_7 = arith.constant 0 : index
    %6 = vector.load %arg5[%c0_6, %c0_7] : memref<8x12xf32, #tpu.memory_space<vmem>>, vector<8x12xf32>
    %c1_i32 = arith.constant 1 : i32
    %7 = arith.muli %arg0, %c1_i32 : i32
    %8 = arith.addi %7, %arg1 : i32
    %9 = tpu.iota {dimensions = array<i32: 0>} : vector<8x1xi32>
    %c8_i32 = arith.constant 8 : i32
    %10 = arith.muli %8, %c8_i32 : i32
    %11 = vector.broadcast %10 : i32 to vector<8x1xi32>
    %12 = arith.addi %9, %11 : vector<8x1xi32>
    %c8_i32_8 = arith.constant 8 : i32
    %13 = vector.broadcast %c8_i32_8 : i32 to vector<8x1xi32>
    %14 = arith.cmpi slt, %12, %13 : vector<8x1xi32>
    %15 = tpu.iota {dimensions = array<i32: 1>} : vector<8x10xi32>
    %16 = vector.broadcast %3 : vector<8x1xi32> to vector<8x10xi32>
    %17 = arith.cmpi eq, %15, %16 : vector<8x10xi32>
    %cst = arith.constant dense<0xFF800000> : vector<8xf32>
    %18 = vector.multi_reduction <maximumf>, %4, %cst [1] : vector<8x10xf32> to vector<8xf32>
    %19 = vector.shape_cast %18 : vector<8xf32> to vector<8x1xf32>
    %20 = vector.broadcast %19 : vector<8x1xf32> to vector<8x10xf32>
    %21 = arith.subf %4, %20 : vector<8x10xf32>
    %22 = math.exp %21 : vector<8x10xf32>
    %cst_9 = arith.constant dense<0.000000e+00> : vector<8xf32>
    %23 = vector.multi_reduction <add>, %22, %cst_9 [1] : vector<8x10xf32> to vector<8xf32>
    %24 = vector.shape_cast %23 : vector<8xf32> to vector<8x1xf32>
    %25 = math.log %24 : vector<8x1xf32>
    %26 = arith.addf %19, %25 : vector<8x1xf32>
    %cst_10 = arith.constant 0.000000e+00 : f32
    %27 = vector.broadcast %cst_10 : f32 to vector<8x10xf32>
    %28 = arith.select %17, %4, %27 : vector<8x10xi1>, vector<8x10xf32>
    %cst_11 = arith.constant dense<0.000000e+00> : vector<8xf32>
    %29 = vector.multi_reduction <add>, %28, %cst_11 [1] : vector<8x10xf32> to vector<8xf32>
    %30 = vector.shape_cast %29 : vector<8xf32> to vector<8x1xf32>
    %31 = arith.subf %26, %30 : vector<8x1xf32>
    %cst_12 = arith.constant 0.000000e+00 : f32
    %32 = vector.broadcast %cst_12 : f32 to vector<8x1xf32>
    %33 = arith.select %14, %31, %32 : vector<8x1xi1>, vector<8x1xf32>
    %cst_13 = arith.constant dense<0.000000e+00> : vector<1xf32>
    %34 = vector.multi_reduction <add>, %33, %cst_13 [0] : vector<8x1xf32> to vector<1xf32>
    %35 = vector.shape_cast %34 : vector<1xf32> to vector<1x1xf32>
    %c0_i32_14 = arith.constant 0 : i32
    %36 = arith.sitofp %c0_i32_14 : i32 to f32
    %37 = vector.broadcast %36 : f32 to vector<8x10xf32>
    %38 = arith.select %17, %5, %37 : vector<8x10xi1>, vector<8x10xf32>
    %cst_15 = arith.constant dense<0.000000e+00> : vector<8xf32>
    %39 = vector.multi_reduction <add>, %38, %cst_15 [1] : vector<8x10xf32> to vector<8xf32>
    %40 = vector.shape_cast %39 : vector<8xf32> to vector<8x1xf32>
    %cst_16 = arith.constant 1.000000e+00 : f32
    %41 = vector.broadcast %cst_16 : f32 to vector<8x1xf32>
    %42 = arith.subf %41, %40 : vector<8x1xf32>
    %cst_17 = arith.constant 0.000000e+00 : f32
    %43 = vector.broadcast %cst_17 : f32 to vector<8x1xf32>
    %44 = arith.select %14, %42, %43 : vector<8x1xi1>, vector<8x1xf32>
    %cst_18 = arith.constant dense<0.000000e+00> : vector<1xf32>
    %45 = vector.multi_reduction <add>, %44, %cst_18 [0] : vector<8x1xf32> to vector<1xf32>
    %46 = vector.shape_cast %45 : vector<1xf32> to vector<1x1xf32>
    %47 = arith.extui %17 : vector<8x10xi1> to vector<8x10xi32>
    %48 = arith.sitofp %47 : vector<8x10xi32> to vector<8x10xf32>
    %49 = arith.truncf %48 : vector<8x10xf32> to vector<8x10xbf16>
    %c0_19 = arith.constant 0 : index
    %c0_20 = arith.constant 0 : index
    %50 = vector.load %arg6[%c0_19, %c0_20] : memref<10x12xbf16, #tpu.memory_space<vmem>>, vector<10x12xbf16>
    %cst_21 = arith.constant dense<0.000000e+00> : vector<8x12xf32>
    %51 = tpu.matmul %49, %50, %cst_21 {dimension_numbers = #tpu.dot_dimension_numbers<[1], [0], [0], [1], [0, 0, 1, 1], [], []>} : vector<8x10xbf16>, vector<10x12xbf16>, vector<8x12xf32> -> vector<8x12xf32>
    %52 = arith.mulf %6, %51 : vector<8x12xf32>
    %53 = tpu.iota {dimensions = array<i32: 1>} : vector<8x12xi32>
    %cst_22 = arith.constant dense<0xFF800000> : vector<8xf32>
    %54 = vector.multi_reduction <maximumf>, %52, %cst_22 [1] : vector<8x12xf32> to vector<8xf32>
    %55 = vector.shape_cast %54 : vector<8xf32> to vector<8x1xf32>
    %56 = vector.broadcast %55 : vector<8x1xf32> to vector<8x12xf32>
    %57 = arith.cmpf oeq, %52, %56 : vector<8x12xf32>
    %c12_i32 = arith.constant 12 : i32
    %58 = vector.broadcast %c12_i32 : i32 to vector<8x12xi32>
    %59 = arith.select %57, %53, %58 : vector<8x12xi1>, vector<8x12xi32>
    %cst_23 = arith.constant dense<2147483647> : vector<8xi32>
    %60 = vector.multi_reduction <minsi>, %59, %cst_23 [1] : vector<8x12xi32> to vector<8xi32>
    %61 = vector.shape_cast %60 : vector<8xi32> to vector<8x1xi32>
    %62 = vector.broadcast %61 : vector<8x1xi32> to vector<8x12xi32>
    %63 = arith.cmpi eq, %53, %62 : vector<8x12xi32>
    %c0_i32_24 = arith.constant 0 : i32
    %64 = arith.sitofp %c0_i32_24 : i32 to f32
    %65 = vector.broadcast %64 : f32 to vector<8x12xf32>
    %66 = arith.select %63, %6, %65 : vector<8x12xi1>, vector<8x12xf32>
    %cst_25 = arith.constant dense<0.000000e+00> : vector<8xf32>
    %67 = vector.multi_reduction <add>, %66, %cst_25 [1] : vector<8x12xf32> to vector<8xf32>
    %68 = vector.shape_cast %67 : vector<8xf32> to vector<8x1xf32>
    %cst_26 = arith.constant 1.000000e+00 : f32
    %69 = vector.broadcast %cst_26 : f32 to vector<8x1xf32>
    %70 = arith.subf %69, %68 : vector<8x1xf32>
    %cst_27 = arith.constant 0.000000e+00 : f32
    %71 = vector.broadcast %cst_27 : f32 to vector<8x1xf32>
    %72 = arith.select %14, %70, %71 : vector<8x1xi1>, vector<8x1xf32>
    %cst_28 = arith.constant dense<0.000000e+00> : vector<1xf32>
    %73 = vector.multi_reduction <add>, %72, %cst_28 [0] : vector<8x1xf32> to vector<1xf32>
    %74 = vector.shape_cast %73 : vector<1xf32> to vector<1x1xf32>
    %c0_29 = arith.constant 0 : index
    %c0_30 = arith.constant 0 : index
    %75 = vector.load %arg8[%c0_29, %c0_30] : memref<1x1xf32, #tpu.memory_space<vmem>>, vector<1x1xf32>
    %76 = arith.addf %75, %35 : vector<1x1xf32>
    %c0_31 = arith.constant 0 : index
    %c0_32 = arith.constant 0 : index
    %77 = vector.load %arg8[%c0_31, %c0_32] : memref<1x1xf32, #tpu.memory_space<vmem>>, vector<1x1xf32>
    tpu.vector_store %arg8[%c0_31, %c0_32], %76 {strides = array<i32>} : memref<1x1xf32, #tpu.memory_space<vmem>>, vector<1x1xf32>,
    %c0_33 = arith.constant 0 : index
    %c0_34 = arith.constant 0 : index
    %78 = vector.load %arg9[%c0_33, %c0_34] : memref<1x1xf32, #tpu.memory_space<vmem>>, vector<1x1xf32>
    %79 = arith.addf %78, %46 : vector<1x1xf32>
    %c0_35 = arith.constant 0 : index
    %c0_36 = arith.constant 0 : index
    %80 = vector.load %arg9[%c0_35, %c0_36] : memref<1x1xf32, #tpu.memory_space<vmem>>, vector<1x1xf32>
    tpu.vector_store %arg9[%c0_35, %c0_36], %79 {strides = array<i32>} : memref<1x1xf32, #tpu.memory_space<vmem>>, vector<1x1xf32>,
    %c0_37 = arith.constant 0 : index
    %c0_38 = arith.constant 0 : index
    %81 = vector.load %arg10[%c0_37, %c0_38] : memref<1x1xf32, #tpu.memory_space<vmem>>, vector<1x1xf32>
    %82 = arith.addf %81, %74 : vector<1x1xf32>
    %c0_39 = arith.constant 0 : index
    %c0_40 = arith.constant 0 : index
    %83 = vector.load %arg10[%c0_39, %c0_40] : memref<1x1xf32, #tpu.memory_space<vmem>>, vector<1x1xf32>
    tpu.vector_store %arg10[%c0_39, %c0_40], %82 {strides = array<i32>} : memref<1x1xf32, #tpu.memory_space<vmem>>, vector<1x1xf32>,
    %c0_i32_41 = arith.constant 0 : i32
    %84 = arith.cmpi eq, %arg1, %c0_i32_41 : i32
    %85 = arith.extui %84 : i1 to i32
    %c0_i32_42 = arith.constant 0 : i32
    %86 = arith.cmpi ne, %85, %c0_i32_42 : i32
    scf.if %86 {
      %87 = tpu.iota {dimensions = array<i32: 2>} : vector<1x1x128xi32>
      %c0_i32_43 = arith.constant 0 : i32
      %88 = vector.broadcast %c0_i32_43 : i32 to vector<1x1x128xi32>
      %89 = arith.cmpi eq, %87, %88 : vector<1x1x128xi32>
      %c0_44 = arith.constant 0 : index
      %c0_45 = arith.constant 0 : index
      %90 = vector.load %arg8[%c0_44, %c0_45] : memref<1x1xf32, #tpu.memory_space<vmem>>, vector<1x1xf32>
      %cst_46 = arith.constant 0.000000e+00 : f32
      %91 = vector.shape_cast %90 : vector<1x1xf32> to vector<1x1x1xf32>
      %92 = vector.broadcast %91 : vector<1x1x1xf32> to vector<1x1x128xf32>
      %93 = vector.broadcast %cst_46 : f32 to vector<1x1x128xf32>
      %94 = arith.select %89, %92, %93 : vector<1x1x128xi1>, vector<1x1x128xf32>
      %c1_i32_47 = arith.constant 1 : i32
      %95 = vector.broadcast %c1_i32_47 : i32 to vector<1x1x128xi32>
      %96 = arith.cmpi eq, %87, %95 : vector<1x1x128xi32>
      %c0_48 = arith.constant 0 : index
      %c0_49 = arith.constant 0 : index
      %97 = vector.load %arg9[%c0_48, %c0_49] : memref<1x1xf32, #tpu.memory_space<vmem>>, vector<1x1xf32>
      %cst_50 = arith.constant 0.000000e+00 : f32
      %98 = vector.shape_cast %97 : vector<1x1xf32> to vector<1x1x1xf32>
      %99 = vector.broadcast %98 : vector<1x1x1xf32> to vector<1x1x128xf32>
      %100 = vector.broadcast %cst_50 : f32 to vector<1x1x128xf32>
      %101 = arith.select %96, %99, %100 : vector<1x1x128xi1>, vector<1x1x128xf32>
      %102 = arith.addf %94, %101 : vector<1x1x128xf32>
      %c2_i32 = arith.constant 2 : i32
      %103 = vector.broadcast %c2_i32 : i32 to vector<1x1x128xi32>
      %104 = arith.cmpi eq, %87, %103 : vector<1x1x128xi32>
      %c0_51 = arith.constant 0 : index
      %c0_52 = arith.constant 0 : index
      %105 = vector.load %arg10[%c0_51, %c0_52] : memref<1x1xf32, #tpu.memory_space<vmem>>, vector<1x1xf32>
      %cst_53 = arith.constant 0.000000e+00 : f32
      %106 = vector.shape_cast %105 : vector<1x1xf32> to vector<1x1x1xf32>
      %107 = vector.broadcast %106 : vector<1x1x1xf32> to vector<1x1x128xf32>
      %108 = vector.broadcast %cst_53 : f32 to vector<1x1x128xf32>
      %109 = arith.select %104, %107, %108 : vector<1x1x128xi1>, vector<1x1x128xf32>
      %110 = arith.addf %102, %109 : vector<1x1x128xf32>
      %c0_54 = arith.constant 0 : index
      %c0_55 = arith.constant 0 : index
      %c0_56 = arith.constant 0 : index
      %111 = vector.load %arg7[%c0_54, %c0_55, %c0_56] : memref<1x1x128xf32, #tpu.memory_space<vmem>>, vector<1x1x128xf32>
      tpu.vector_store %arg7[%c0_54, %c0_55, %c0_56], %110 {strides = array<i32>} : memref<1x1x128xf32, #tpu.memory_space<vmem>>, vector<1x1x128xf32>,
    } else {
    }
    return
  }
  func.func @transform_0(%arg0: i32, %arg1: i32) -> (i32, i32) {
    %c1_i32 = arith.constant 1 : i32
    %0 = arith.muli %arg0, %c1_i32 : i32
    %1 = arith.addi %0, %arg1 : i32
    %c0_i32 = arith.constant 0 : i32
    %c0_i32_0 = arith.constant 0 : i32
    return %1, %c0_i32 : i32, i32
  }
  func.func @transform_1(%arg0: i32, %arg1: i32) -> (i32, i32) {
    %c1_i32 = arith.constant 1 : i32
    %0 = arith.muli %arg0, %c1_i32 : i32
    %1 = arith.addi %0, %arg1 : i32
    %c0_i32 = arith.constant 0 : i32
    %c0_i32_0 = arith.constant 0 : i32
    return %1, %c0_i32 : i32, i32
  }
  func.func @transform_2(%arg0: i32, %arg1: i32) -> (i32, i32) {
    %c1_i32 = arith.constant 1 : i32
    %0 = arith.muli %arg0, %c1_i32 : i32
    %1 = arith.addi %0, %arg1 : i32
    %c0_i32 = arith.constant 0 : i32
    %c0_i32_0 = arith.constant 0 : i32
    return %1, %c0_i32 : i32, i32
  }
  func.func @transform_3(%arg0: i32, %arg1: i32) -> (i32, i32) {
    %c1_i32 = arith.constant 1 : i32
    %0 = arith.muli %arg0, %c1_i32 : i32
    %1 = arith.addi %0, %arg1 : i32
    %c0_i32 = arith.constant 0 : i32
    %c0_i32_0 = arith.constant 0 : i32
    return %1, %c0_i32 : i32, i32
  }
  func.func @transform_4(%arg0: i32, %arg1: i32) -> (i32, i32) {
    %c0_i32 = arith.constant 0 : i32
    %c0_i32_0 = arith.constant 0 : i32
    %c0_i32_1 = arith.constant 0 : i32
    return %c0_i32, %c0_i32_0 : i32, i32
  }
  func.func @transform_5(%arg0: i32, %arg1: i32) -> (i32, i32, i32) {
    %c0_i32 = arith.constant 0 : i32
    %c0_i32_0 = arith.constant 0 : i32
    %c0_i32_1 = arith.constant 0 : i32
    return %arg0, %c0_i32, %c0_i32_0 : i32, i32, i32
  }
}

</mosaic_0001>

<bundles_post_ra>
// kernel: tpu_custom_call.1
= control target key start
LH: loop header
LB: loop body
LE: loop exit
PB: predicated region body
PF: predicated region fallthrough
CT: control target
= control target key end

     0   :  { %10 = vsyncpa [#allocation6], 0  ;;  %s496_s0 = inlined_call_operand.vmem [shape: s32[8,1], index: 0, kind: input, shape index: {}]   ;;  %s497_s1 = inlined_call_operand.vmem [shape: f32[8,10], index: 1, kind: input, shape index: {}]   ;;  %s498_s2 = inlined_call_operand.hbm [shape: f32[8,10], index: 2, kind: input, shape index: {}]   ;;  %s499_s3 = inlined_call_operand.hbm [shape: f32[8,12], index: 3, kind: input, shape index: {}]   ;;  %s500_s4 = inlined_call_operand.vmem [shape: bf16[10,12], index: 4, kind: input, shape index: {}]   ;;  %s501_s5 = inlined_call_operand.hbm [shape: f32[1,1,128], index: 5, kind: output, shape index: {}]  }
   0x1   :  { %11 = vsyncpa [#allocation9], 0 }
   0x2   :  { %12 = vsyncpa [#allocation7], 0  ;;  %s412_s18 = smov [#allocation5]   ;;  %s413_s20 = smov [#allocation8]  }
   0x3   :  { %s38_s19 = sshll.u32 %s412_s18, 4  ;;  %s51_s21 = sshll.u32 %s413_s20, 4  ;;  %s39_s19 = int_to_ptr.vmem [resolvable:$true] %s38_s19  ;;  %s52_s21 = int_to_ptr.vmem [resolvable:$true] %s51_s21 }
   0x4   :  { %s354_s22 = scalar_lea.vmem %s39_s19, 128  ;;  %p359_p1 = scmp.lt.s32.totalorder %s39_s19, %s39_s19 }
   0x5   :  { %p355_p0 = scmp.ne.s32.totalorder %s39_s19, %s354_s22  ;;  %p360_p2 = scmp.lt.s32.totalorder %s354_s22, %s354_s22 }
   0x7   :  { %p361_p3 = por %p360_p2, %p359_p1 }
   0x9   :  { %p362_p4 = pnand %p361_p3, %p355_p0 }
   0xb   :  { %365 = shalt.err (!%p362_p4)
}
   0xc   :  { %41 = dma.hbm_to_vmem [thread:$0]  %s498_s2, 128, %s39_s19, [#allocation6]  }
   0xd   :  { %s374_s25 = scalar_lea.vmem %s52_s21, 128  ;;  %p379_p6 = scmp.lt.s32.totalorder %s52_s21, %s52_s21 }
   0xe   :  { %p375_p5 = scmp.ne.s32.totalorder %s52_s21, %s374_s25  ;;  %p380_p7 = scmp.lt.s32.totalorder %s374_s25, %s374_s25 }
  0x10   :  { %p381_p8 = por %p380_p7, %p379_p6 }
  0x12   :  { %p382_p9 = pnand %p381_p8, %p375_p5 }
  0x14   :  { %385 = shalt.err (!%p382_p9)
}
  0x15   :  { %54 = dma.hbm_to_vmem [thread:$0]  %s499_s3, 128, %s52_s21, [#allocation9]  }
  0x16   :  { %406 = dma.done.wait [#allocation6], 128  }
  0x17   :  { %407 = vsyncadd [#allocation6], 4294967168 }
  0x18   :  { %408 = dma.done.wait [#allocation9], 128  }
  0x19   :  { %409 = vsyncadd [#allocation9], 4294967168  ;;  %vm92_vm0 = vcmask 0   ;;  %v414_v0 = vmov 0   ;;  %v415_v1 = vmov 0.0   ;;  %v96_v2 = vld [vmem:[%s496_s0] sm:$0xff]  ;;  %v107_v5 = vlaneseq }
  0x1a   :  { %339 = vset.pattern.permute.xlu0 %v414_v0  ;;  %93 = vst.msk [vmem:[#allocation2] sm:$0x1] %vm92_vm0, %v415_v1  ;;  %94 = vst.msk [vmem:[#allocation3] sm:$0x1] %vm92_vm0, %v415_v1  ;;  %327 = vmatprep.subr.bf16.mxu0 %v415_v1  ;;  %vm163_vm1 = vcmask 1044480   ;;  %vm416_vm2 = vmmov 0  }
  0x1b   :  { %95 = vst.msk [vmem:[#allocation4] sm:$0x1] %vm92_vm0, %v415_v1  ;;  %340 = vset.pattern.permute.xlu1 %v414_v0  ;;  %329 = vmatprep.mubr.msk.bf16.mxu0 %vm416_vm2, %v415_v1  ;;  %v341_v3 = vld [vmem:[%s500_s4] sm:$0x1f]   ;;  %v464_v6 = vand.u32 127, %v107_v5  ;;  %vm113_vm4 = vcmask 80896  }
  0x1c   :  { %110 = vperm.xlu0 %339, %v96_v2   ;;  %v165_v4 = vsel %vm163_vm1, %v341_v3, 0  ;;  %v99_v10 = vld [vmem:[#allocation8] sm:$0xff]  ;;  %vm208_vm5 = vcmask 97280   ;;  %v97_v22 = vld [vmem:[%s497_s1] sm:$0xff]  ;;  %v98_v34 = vld [vmem:[#allocation5] sm:$0xff]  ;;  %s417_s1 = smov [#allocation10]  }
  0x1d   :  { %328 = vmatpush3.bf16.msra.mxu0 %v165_v4  ;;  %v114_v23 = vsel %vm113_vm4, %v97_v22, -inf  ;;  %vm255_vm9 = vcmp.eq.s32.totalorder %v464_v6, 0  ;;  %vm267_vm10 = vcmp.eq.s32.totalorder %v464_v6, 1  ;;  %vm280_vm11 = vcmp.eq.s32.totalorder %v464_v6, 2  ;;  %s300_s30 = sshll.u32 %s417_s1, 4  ;;  %s301_s30 = int_to_ptr.vmem [resolvable:$true] %s300_s30 }
  0x1e   :  { %s386_s6 = scalar_lea.vmem %s301_s30, 16  ;;  %s390_s7 = scalar_lea.vmem %s301_s30, 32 }
  0x1f   :  { %p387_p10 = scmp.ne.s32.totalorder %s301_s30, %s386_s6  ;;  %p391_p11 = scmp.lt.s32.totalorder %s301_s30, %s301_s30 }
  0x20   :  { %p392_p12 = scmp.lt.s32.totalorder %s390_s7, %s386_s6 }
  0x21   :  { %v246_v58 = vld [vmem:[#allocation3] sm:$0x1]  ;;  %v242_v2 = vld [vmem:[#allocation2] sm:$0x1] }
  0x22   :  { %p393_p13 = por %p392_p12, %p391_p11 }
  0x24   :  { %p394_p0 = pnand %p393_p13, %p387_p10 }
  0x97   :  { %v111_v7 = vpop.permute.xlu0 %110 }
  0x98   :  { %vm112_vm3 = vcmp.eq.s32.totalorder %v464_v6, %v111_v7 }
  0x99   :  { %v322_v8 = vsel %vm112_vm3, 1.0, %v415_v1  ;;  %v126_v33 = vsel %vm112_vm3, %v97_v22, 0.0  ;;  %v138_v36 = vsel %vm112_vm3, %v98_v34, 0.0 }
  0x9a   :  { %v152_v9 = vpack.c.bf16 %v322_v8, %v322_v8  ;;  %v127_v35 = vsel %vm113_vm4, %v126_v33, 0.0  ;;  %v139_v37 = vsel %vm113_vm4, %v138_v36, 0.0 }
  0x9c   :  { %330 = vmatmul.mubr.msk.bf16.vlgmr.msra.gmra.mxu0 %vm113_vm4, %v152_v9 }
 0x15c   :  { %v201_v11 = vpop.f32.mrf.mxu0 }
 0x15d   :  { %v207_v12 = vmul.f32 %v201_v11, %v99_v10 }
 0x15e   :  { %v331_v13 = vpop.f32.mrf.mxu0 }
 0x15f   :  { %v209_v14 = vsel %vm208_vm5, %v207_v12, -inf }
 0x160   :  { %210 = vmax.xlane.f32.xlu0 %v209_v14  ;;  %v204_v15 = vpop.f32.mrf.mxu0 }
 0x162   :  { %v332_v16 = vpop.f32.mrf.mxu0 }
 0x163   :  { %v249_v16 = vld [vmem:[#allocation4] sm:$0x1] }
 0x1e9   :  { %v211_v17 = vpop.xlane.xlu0 %210 }
 0x1ea   :  { %vm212_vm6 = vcmp.eq.f32.partialorder %v207_v12, %v211_v17 }
 0x1eb   :  { %v213_v18 = vsel %vm212_vm6, %v464_v6, 12 }
 0x1ec   :  { %v214_v19 = vsel %vm208_vm5, %v213_v18, 2147483647 }
 0x1ed   :  { %v216_v20 = vshra.s32 %v214_v19, 16  ;;  %v215_v24 = vand.u32 65535, %v214_v19 }
 0x1ef   :  { %v218_v21 = vcvt.s32.f32 %v216_v20  ;;  %v217_v26 = vcvt.s32.f32 %v215_v24  ;;  %v263_v20 = vshrl.u32 %v107_v5, 7 }
 0x1f1   :  { %219 = vmin.xlane.f32.xlu1 %v218_v21 }
 0x1f5   :  { %115 = vmax.xlane.f32.xlu1 %v114_v23 }
 0x27a   :  { %v220_v25 = vpop.xlane.xlu1 %219 }
 0x27b   :  { %vm221_vm7 = vcmp.eq.f32.partialorder %v218_v21, %v220_v25  ;;  %v226_v38 = vcvt.f32.s32 %v220_v25 }
 0x27c   :  { %v222_v27 = vsel %vm221_vm7, %v217_v26, inf }
 0x27d   :  { %223 = vmin.xlane.f32.xlu1 %v222_v27  ;;  %v227_v40 = vshll.u32 %v226_v38, 16 }
 0x27e   :  { %v116_v28 = vpop.xlane.xlu1 %115 }
 0x27f   :  { %v117_v29 = vsub.f32 %v97_v22, %v116_v28  ;;  %v264_v22 = vsub.s32 0, %v263_v20 }
 0x281   :  { %v118_v30 = vmul.f32 1.442695, %v117_v29 }
 0x283   :  { %342 = vpow2.f32 %v118_v30 }
 0x290   :  { %v343_v31 = vpop.eup %342 }
 0x291   :  { %v120_v32 = vsel %vm113_vm4, %v343_v31, 0.0 }
 0x292   :  { %121 = vadd.xlane.f32.xlu1 %v120_v32 }
 0x296   :  { %128 = vadd.xlane.f32.xlu1 %v127_v35 }
 0x29a   :  { %140 = vadd.xlane.f32.xlu1 %v139_v37 }
 0x306   :  { %v224_v39 = vpop.xlane.xlu1 %223 }
 0x307   :  { %v225_v41 = vcvt.f32.s32 %v224_v39 }
 0x309   :  { %v228_v42 = vadd.s32 %v227_v40, %v225_v41 }
 0x30b   :  { %vm229_vm8 = vcmp.eq.s32.totalorder %v464_v6, %v228_v42 }
 0x30c   :  { %v230_v43 = vsel %vm229_vm8, %v99_v10, 0.0 }
 0x30d   :  { %v231_v44 = vsel %vm208_vm5, %v230_v43, 0.0 }
 0x30e   :  { %232 = vadd.xlane.f32.xlu1 %v231_v44 }
 0x31b   :  { %v122_v45 = vpop.xlane.xlu1 %121 }
 0x31c   :  { %344 = vlog2.f32 %v122_v45 }
 0x31f   :  { %v129_v46 = vpop.xlane.xlu1 %128 }
 0x323   :  { %v141_v47 = vpop.xlane.xlu1 %140 }
 0x324   :  { %v142_v48 = vsub.f32 1.0, %v141_v47 }
 0x326   :  { %v144_v49 = vrot.slane %v142_v48, 4 }
 0x328   :  { %v145_v50 = vadd.f32 %v144_v49, %v142_v48 }
 0x329   :  { %v345_v51 = vpop.eup %344 }
 0x32a   :  { %v124_v52 = vmul.f32 0.6931472, %v345_v51  ;;  %v146_v53 = vrot.slane %v145_v50, 2 }
 0x32c   :  { %v125_v54 = vadd.f32 %v124_v52, %v116_v28  ;;  %v147_v55 = vadd.f32 %v146_v53, %v145_v50 }
 0x32e   :  { %v130_v56 = vsub.f32 %v125_v54, %v129_v46  ;;  %v148_v57 = vrot.slane %v147_v55, 1 }
 0x330   :  { %v132_v59 = vrot.slane %v130_v56, 4  ;;  %v149_v60 = vadd.f32 %v148_v57, %v147_v55 }
 0x332   :  { %v133_v61 = vadd.f32 %v132_v59, %v130_v56  ;;  %v247_v62 = vadd.f32 %v246_v58, %v149_v60 }
 0x334   :  { %v134_v63 = vrot.slane %v133_v61, 2  ;;  %248 = vst.msk [vmem:[#allocation3] sm:$0x1] %vm92_vm0, %v247_v62 }
 0x336   :  { %v135_v0 = vadd.f32 %v134_v63, %v133_v61 }
 0x338   :  { %v136_v1 = vrot.slane %v135_v0, 1 }
 0x33a   :  { %v137_v3 = vadd.f32 %v136_v1, %v135_v0 }
 0x33b   :  { %v268_v4 = vld [vmem:[#allocation3] sm:$0x1] }
 0x33c   :  { %v243_v7 = vadd.f32 %v242_v2, %v137_v3  ;;  %271 = vperm.xlu0 %339, %v268_v4  }
 0x33e   :  { %245 = vst.msk [vmem:[#allocation2] sm:$0x1] %vm92_vm0, %v243_v7 }
 0x345   :  { %v256_v8 = vld [vmem:[#allocation2] sm:$0x1] }
 0x346   :  { %259 = vperm.xlu1 %340, %v256_v8  }
 0x397   :  { %v233_v9 = vpop.xlane.xlu1 %232 }
 0x398   :  { %v234_v10 = vsub.f32 1.0, %v233_v9 }
 0x39a   :  { %v236_v11 = vrot.slane %v234_v10, 4 }
 0x39c   :  { %v237_v12 = vadd.f32 %v236_v11, %v234_v10 }
 0x39e   :  { %v238_v13 = vrot.slane %v237_v12, 2 }
 0x3a0   :  { %v239_v14 = vadd.f32 %v238_v13, %v237_v12 }
 0x3a2   :  { %v240_v15 = vrot.slane %v239_v14, 1 }
 0x3a4   :  { %v241_v17 = vadd.f32 %v240_v15, %v239_v14 }
 0x3a6   :  { %v250_v18 = vadd.f32 %v249_v16, %v241_v17 }
 0x3a8   :  { %251 = vst.msk [vmem:[#allocation4] sm:$0x1] %vm92_vm0, %v250_v18 }
 0x3af   :  { %v281_v19 = vld [vmem:[#allocation4] sm:$0x1] }
 0x3b0   :  { %284 = vperm.xlu1 %340, %v281_v19  }
 0x3b7   :  { %v272_v23 = vpop.permute.xlu0 %271 }
 0x3b8   :  { %v277_v25 = vrot.slane %v272_v23, %v264_v22 }
 0x3ba   :  { %v278_v28 = vsel %vm267_vm10, %v277_v25, 0.0 }
 0x3c1   :  { %v260_v21 = vpop.permute.xlu1 %259 }
 0x3c2   :  { %v265_v24 = vrot.slane %v260_v21, %v264_v22 }
 0x3c4   :  { %v266_v26 = vsel %vm255_vm9, %v265_v24, 0.0 }
 0x3c5   :  { %v279_v30 = vadd.f32 %v278_v28, %v266_v26 }
 0x42b   :  { %v285_v27 = vpop.permute.xlu1 %284 }
 0x42c   :  { %v290_v29 = vrot.slane %v285_v27, %v264_v22 }
 0x42e   :  { %v291_v31 = vsel %vm280_vm11, %v290_v29, 0.0 }
 0x42f   :  { %v292_v5 = vadd.f32 %v291_v31, %v279_v30 }
 0x431   :  { %293 = vst [vmem:[#allocation10] sm:$0x1] %v292_v5 }
 0x432   :  { %397 = shalt.err (!%p394_p0)
}
 0x433   :  { %303 = dma.vmem_to_hbm [thread:$0]  %s301_s30, 16, %s501_s5, [#allocation7]  }
 0x434   :  { %410 = dma.done.wait [#allocation7], 16  }
 0x435   :  { %411 = vsyncadd [#allocation7], 4294967280 }
 0x436   :  { %307 = vsyncpa [#allocation6], 1 }
 0x437   :  { %308 = vsyncpa [#allocation9], 1 }
 0x438   :  { %309 = vsyncpa [#allocation7], 1 }

</bundles_post_ra>
